<compile_context>
chip_gen: v6e
topology: v6e:2x2x1
jax: 0.10.0
libtpu: 0.0.40
codegen_flags: <defaults>
</compile_context>

<pallas_src>
import jax
import jax.numpy as jnp
from jax.experimental import pallas as pl
from jax.experimental.pallas import tpu as pltpu


def _layernorm(h, gamma, beta, eps=1e-5):
    mu = jnp.mean(h, axis=-1, keepdims=True)
    var = jnp.mean((h - mu) ** 2, axis=-1, keepdims=True)
    return (h - mu) * jax.lax.rsqrt(var + eps) * gamma + beta


def prepare_block_params(params, compute_dtype=jnp.bfloat16):
    """One-time weight repack (hoisted out of the per-call path):
    bf16 MXU operands, head-major projection weight, and all gamma/beta/bias
    vectors packed into a single (8, 4E) f32 slab (one dense DMA at E=32)."""
    E = params["wproj"].shape[0]
    H, _, hs = params["wq"].shape
    E4 = params["w1"].shape[1]

    def row(v):
        v = v.reshape(1, -1).astype(jnp.float32)
        return jnp.pad(v, ((0, 0), (0, E4 - v.shape[1])))

    vecs = jnp.concatenate([
        row(params["g1"]), row(params["be1"]),
        row(params["g2"]), row(params["be2"]),
        row(params["bproj"]), row(params["b2"]),
        row(params["b1"]), jnp.zeros((1, E4), jnp.float32),
    ], axis=0)                                                   # (8, 4E)

    return {
        "wq": params["wq"].astype(compute_dtype),                # (H, E, hs)
        "wk": params["wk"].astype(compute_dtype),
        "wv": params["wv"].astype(compute_dtype),
        # (E, E) -> (H, hs, E): row block h multiplies head h's output; summing the
        # per-head projections replaces the lane concat entirely.
        "wprojf": params["wproj"].reshape(H, hs, E).astype(compute_dtype),
        "w1": params["w1"].astype(compute_dtype),                # (E, 4E)
        "w2": params["w2"].astype(compute_dtype),                # (4E, E)
        "vecs": vecs,                                            # (8, 4E) f32
    }


@jax.jit
def transformer_block(x, prep):
    B, T, E = x.shape
    H, _, hs = prep["wq"].shape
    E4 = prep["w1"].shape[1]
    cdt = prep["wq"].dtype

    def kernel(x_ref, wq_ref, wk_ref, wv_ref, wprojf_ref, w1_ref, w2_ref,
               vecs_ref, o_ref):
        xin = x_ref[0].astype(jnp.float32)                       # (T, E) f32
        g1, be1 = vecs_ref[0:1, :E], vecs_ref[1:2, :E]
        g2, be2 = vecs_ref[2:3, :E], vecs_ref[3:4, :E]
        bproj, b2 = vecs_ref[4:5, :E], vecs_ref[5:6, :E]
        b1 = vecs_ref[6:7, :]                                    # (1, 4E)

        # ---- LayerNorm 1 (f32 VPU math) ----
        h1 = _layernorm(xin, g1, be1)

        # ---- Q/K/V for ALL heads at once: head-batched bf16 matmuls against the
        #      stacked (H,E,hs) weights — no per-head loop, no hs-wide lane slices.
        h1b = jnp.broadcast_to(h1.astype(cdt)[None], (H, T, E))  # (H, T, E)
        q = jnp.einsum('hte,hed->htd', h1b, wq_ref[...],
                       preferred_element_type=jnp.float32)       # (H, T, hs)
        k = jnp.einsum('hte,hed->htd', h1b, wk_ref[...],
                       preferred_element_type=jnp.float32)
        v = jnp.einsum('hte,hed->htd', h1b, wv_ref[...],
                       preferred_element_type=jnp.float32)

        # ---- causal attention, batched over heads ----
        scale = E ** (-0.05)            # exactly the PyTorch Head: wei *= C ** (-0.05)
        rows = jax.lax.broadcasted_iota(jnp.int32, (T, T), 0)
        cols = jax.lax.broadcasted_iota(jnp.int32, (T, T), 1)
        causal = jnp.where(rows >= cols, 0.0, -1e30).astype(jnp.float32)[None]
        # TODO(synk): for long T, tile attention over (q_tile, kv_tile) and pl.when-skip
        # fully masked upper-triangular tiles instead of a dense (T,T) additive bias.

        s = jnp.einsum('htd,hsd->hts', q.astype(cdt), k.astype(cdt),
                       preferred_element_type=jnp.float32) * scale + causal
        s = s - jnp.max(s, axis=-1, keepdims=True)
        p = jnp.exp(s)
        p = p * pl.reciprocal(jnp.sum(p, axis=-1, keepdims=True), approx=False)
        # dropout on attention weights: identity (inference)

        o = jnp.einsum('hts,hsd->htd', p.astype(cdt), v.astype(cdt),
                       preferred_element_type=jnp.float32)       # (H, T, hs)

        # ---- output projection folded per head, summed over heads (no concat) ----
        proj = jnp.einsum('htd,hde->hte', o.astype(cdt), wprojf_ref[...],
                          preferred_element_type=jnp.float32)    # (H, T, E)
        attn = jnp.sum(proj, axis=0) + bproj                     # (T, E)
        x1 = xin + attn                                          # dropout after proj: identity

        # ---- LayerNorm 2 + FFN (bf16 MXU operands, f32 accumulation) ----
        h2 = _layernorm(x1, g2, be2)
        f = jnp.dot(h2.astype(cdt), w1_ref[...],
                    preferred_element_type=jnp.float32) + b1
        f = jnp.maximum(f, 0.0)
        f = jnp.dot(f.astype(cdt), w2_ref[...],
                    preferred_element_type=jnp.float32) + b2
        # dropout in FFN: identity (inference)

        o_ref[0] = (x1 + f).astype(o_ref.dtype)

    return pl.pallas_call(
        kernel,
        out_shape=jax.ShapeDtypeStruct((B, T, E), x.dtype),
        grid_spec=pltpu.PrefetchScalarGridSpec(
            num_scalar_prefetch=0,
            grid=(B,),                                           # one sequence per step
            in_specs=[
                pl.BlockSpec((1, T, E), lambda b: (b, 0, 0)),    # x (per-batch block)
                pl.BlockSpec((H, E, hs), lambda b: (0, 0, 0)),   # Wq  (resident)
                pl.BlockSpec((H, E, hs), lambda b: (0, 0, 0)),   # Wk  (resident)
                pl.BlockSpec((H, E, hs), lambda b: (0, 0, 0)),   # Wv  (resident)
                pl.BlockSpec((H, hs, E), lambda b: (0, 0, 0)),   # Wproj head-major
                pl.BlockSpec((E, E4), lambda b: (0, 0)),         # W1
                pl.BlockSpec((E4, E), lambda b: (0, 0)),         # W2
                pl.BlockSpec((8, E4), lambda b: (0, 0)),         # packed vec slab
            ],
            out_specs=pl.BlockSpec((1, T, E), lambda b: (b, 0, 0)),
        ),
        compiler_params=pltpu.CompilerParams(
            dimension_semantics=("parallel",)),                  # v7x megacore shardable
    )(x, prep["wq"], prep["wk"], prep["wv"], prep["wprojf"],
      prep["w1"], prep["w2"], prep["vecs"])


def reference_block(x, p):
    """Pure-JAX f32 reference mirroring the PyTorch forward (dropout = identity)."""
    def ln(h, g, b):
        mu = jnp.mean(h, axis=-1, keepdims=True)
        var = jnp.mean((h - mu) ** 2, axis=-1, keepdims=True)
        return (h - mu) / jnp.sqrt(var + 1e-5) * g + b

    B, T, E = x.shape
    H, _, hs = p["wq"].shape
    h = ln(x, p["g1"][0], p["be1"][0])
    scale = E ** (-0.05)
    mask = jnp.tril(jnp.ones((T, T), dtype=bool))
    outs = []
    for hd in range(H):
        q = h @ p["wq"][hd]; k = h @ p["wk"][hd]; v = h @ p["wv"][hd]
        wei = q @ jnp.swapaxes(k, -1, -2) * scale
        wei = jnp.where(mask, wei, -jnp.inf)
        wei = jax.nn.softmax(wei, axis=-1)
        outs.append(wei @ v)
    attn = jnp.concatenate(outs, axis=-1) @ p["wproj"] + p["bproj"][0]
    x1 = x + attn
    h2 = ln(x1, p["g2"][0], p["be2"][0])
    f = jnp.maximum(h2 @ p["w1"] + p["b1"][0], 0.0) @ p["w2"] + p["b2"][0]
    return x1 + f


if __name__ == "__main__":
    B, T, E, num_head = 2, 8, 32, 4
    hs = E // num_head

    key = jax.random.PRNGKey(0)
    ks = jax.random.split(key, 14)
    s = 0.1
    params = {
        "wq": jax.random.normal(ks[0], (num_head, E, hs), jnp.float32) * s,
        "wk": jax.random.normal(ks[1], (num_head, E, hs), jnp.float32) * s,
        "wv": jax.random.normal(ks[2], (num_head, E, hs), jnp.float32) * s,
        "wproj": jax.random.normal(ks[3], (E, E), jnp.float32) * s,
        "bproj": jax.random.normal(ks[4], (1, E), jnp.float32) * s,
        "g1": 1.0 + jax.random.normal(ks[5], (1, E), jnp.float32) * 0.01,
        "be1": jax.random.normal(ks[6], (1, E), jnp.float32) * 0.01,
        "g2": 1.0 + jax.random.normal(ks[7], (1, E), jnp.float32) * 0.01,
        "be2": jax.random.normal(ks[8], (1, E), jnp.float32) * 0.01,
        "w1": jax.random.normal(ks[9], (E, 4 * E), jnp.float32) * s,
        "b1": jax.random.normal(ks[10], (1, 4 * E), jnp.float32) * s,
        "w2": jax.random.normal(ks[11], (4 * E, E), jnp.float32) * s,
        "b2": jax.random.normal(ks[12], (1, E), jnp.float32) * s,
    }

    x = jax.random.normal(ks[13], (B, T, E), jnp.float32)

    prep = prepare_block_params(params)          # one-time, hoisted weight fusion
    out = transformer_block(x, prep)
    out = jax.block_until_ready(out)

    ref = reference_block(x, params)
    assert out.shape == (B, T, E)
    # Tolerance 2e-2 absorbs bf16 MXU-operand rounding only (accumulation is f32 and the
    # softmax reciprocal is exact); LN/softmax/residual math is f32 and matches the reference.
    assert jnp.allclose(out, ref, rtol=2e-2, atol=2e-2), "mismatch vs reference"

    print("KERNEL_OK")
</pallas_src>

<mosaic_0001>
module attributes {stable_mosaic.version = 11 : i64} {
  func.func @kernel(%arg0: i32, %arg1: memref<1x8x32xf32, #tpu.memory_space<vmem>>, %arg2: memref<4x32x8xbf16, #tpu.memory_space<vmem>>, %arg3: memref<4x32x8xbf16, #tpu.memory_space<vmem>>, %arg4: memref<4x32x8xbf16, #tpu.memory_space<vmem>>, %arg5: memref<4x8x32xbf16, #tpu.memory_space<vmem>>, %arg6: memref<32x128xbf16, #tpu.memory_space<vmem>>, %arg7: memref<128x32xbf16, #tpu.memory_space<vmem>>, %arg8: memref<8x128xf32, #tpu.memory_space<vmem>>, %arg9: memref<1x8x32xf32, #tpu.memory_space<vmem>>) attributes {dimension_semantics = [#tpu.dimension_semantics<parallel>], iteration_bounds = array<i64: 2>, scalar_prefetch = 0 : i64, scratch_operands = 0 : i64, tpu.core_type = #tpu.core_type<tc>, window_params = [{transform_indices = @transform_0, window_bounds = array<i64: 1, 8, 32>}, {pipeline_mode = #tpu.pipeline_mode<synchronous>, transform_indices = @transform_1, window_bounds = array<i64: 4, 32, 8>}, {pipeline_mode = #tpu.pipeline_mode<synchronous>, transform_indices = @transform_2, window_bounds = array<i64: 4, 32, 8>}, {pipeline_mode = #tpu.pipeline_mode<synchronous>, transform_indices = @transform_3, window_bounds = array<i64: 4, 32, 8>}, {pipeline_mode = #tpu.pipeline_mode<synchronous>, transform_indices = @transform_4, window_bounds = array<i64: 4, 8, 32>}, {pipeline_mode = #tpu.pipeline_mode<synchronous>, transform_indices = @transform_5, window_bounds = array<i64: 32, 128>}, {pipeline_mode = #tpu.pipeline_mode<synchronous>, transform_indices = @transform_6, window_bounds = array<i64: 128, 32>}, {pipeline_mode = #tpu.pipeline_mode<synchronous>, transform_indices = @transform_7, window_bounds = array<i64: 8, 128>}, {transform_indices = @transform_8, window_bounds = array<i64: 1, 8, 32>}]} {
    %c0 = arith.constant 0 : index
    %c0_0 = arith.constant 0 : index
    %c0_1 = arith.constant 0 : index
    %0 = vector.load %arg1[%c0, %c0_0, %c0_1] : memref<1x8x32xf32, #tpu.memory_space<vmem>>, vector<1x8x32xf32>
    %1 = vector.shape_cast %0 : vector<1x8x32xf32> to vector<8x32xf32>
    %c0_2 = arith.constant 0 : index
    %c0_3 = arith.constant 0 : index
    %2 = vector.load %arg8[%c0_2, %c0_3] : memref<8x128xf32, #tpu.memory_space<vmem>>, vector<1x32xf32>
    %c1 = arith.constant 1 : index
    %c0_4 = arith.constant 0 : index
    %3 = vector.load %arg8[%c1, %c0_4] : memref<8x128xf32, #tpu.memory_space<vmem>>, vector<1x32xf32>
    %c2 = arith.constant 2 : index
    %c0_5 = arith.constant 0 : index
    %4 = vector.load %arg8[%c2, %c0_5] : memref<8x128xf32, #tpu.memory_space<vmem>>, vector<1x32xf32>
    %c3 = arith.constant 3 : index
    %c0_6 = arith.constant 0 : index
    %5 = vector.load %arg8[%c3, %c0_6] : memref<8x128xf32, #tpu.memory_space<vmem>>, vector<1x32xf32>
    %c4 = arith.constant 4 : index
    %c0_7 = arith.constant 0 : index
    %6 = vector.load %arg8[%c4, %c0_7] : memref<8x128xf32, #tpu.memory_space<vmem>>, vector<1x32xf32>
    %c5 = arith.constant 5 : index
    %c0_8 = arith.constant 0 : index
    %7 = vector.load %arg8[%c5, %c0_8] : memref<8x128xf32, #tpu.memory_space<vmem>>, vector<1x32xf32>
    %c6 = arith.constant 6 : index
    %c0_9 = arith.constant 0 : index
    %8 = vector.load %arg8[%c6, %c0_9] : memref<8x128xf32, #tpu.memory_space<vmem>>, vector<1x128xf32>
    %cst = arith.constant dense<0.000000e+00> : vector<8xf32>
    %9 = vector.multi_reduction <add>, %1, %cst [1] : vector<8x32xf32> to vector<8xf32>
    %10 = vector.shape_cast %9 : vector<8xf32> to vector<8x1xf32>
    %cst_10 = arith.constant 3.200000e+01 : f32
    %11 = vector.broadcast %cst_10 : f32 to vector<8x1xf32>
    %12 = arith.divf %10, %11 : vector<8x1xf32>
    %13 = vector.broadcast %12 : vector<8x1xf32> to vector<8x32xf32>
    %14 = arith.subf %1, %13 : vector<8x32xf32>
    %15 = arith.mulf %14, %14 : vector<8x32xf32>
    %cst_11 = arith.constant dense<0.000000e+00> : vector<8xf32>
    %16 = vector.multi_reduction <add>, %15, %cst_11 [1] : vector<8x32xf32> to vector<8xf32>
    %17 = vector.shape_cast %16 : vector<8xf32> to vector<8x1xf32>
    %cst_12 = arith.constant 3.200000e+01 : f32
    %18 = vector.broadcast %cst_12 : f32 to vector<8x1xf32>
    %19 = arith.divf %17, %18 : vector<8x1xf32>
    %20 = vector.broadcast %12 : vector<8x1xf32> to vector<8x32xf32>
    %21 = arith.subf %1, %20 : vector<8x32xf32>
    %cst_13 = arith.constant 9.99999974E-6 : f32
    %22 = vector.broadcast %cst_13 : f32 to vector<8x1xf32>
    %23 = arith.addf %19, %22 : vector<8x1xf32>
    %24 = math.rsqrt %23 : vector<8x1xf32>
    %25 = vector.broadcast %24 : vector<8x1xf32> to vector<8x32xf32>
    %26 = arith.mulf %21, %25 : vector<8x32xf32>
    %27 = vector.broadcast %2 : vector<1x32xf32> to vector<8x32xf32>
    %28 = arith.mulf %26, %27 : vector<8x32xf32>
    %29 = vector.broadcast %3 : vector<1x32xf32> to vector<8x32xf32>
    %30 = arith.addf %28, %29 : vector<8x32xf32>
    %31 = arith.truncf %30 : vector<8x32xf32> to vector<8x32xbf16>
    %32 = vector.shape_cast %31 : vector<8x32xbf16> to vector<1x8x32xbf16>
    %33 = vector.shape_cast %32 : vector<1x8x32xbf16> to vector<1x8x32xbf16>
    %34 = vector.broadcast %33 : vector<1x8x32xbf16> to vector<4x8x32xbf16>
    %c0_14 = arith.constant 0 : index
    %c0_15 = arith.constant 0 : index
    %c0_16 = arith.constant 0 : index
    %35 = vector.load %arg2[%c0_14, %c0_15, %c0_16] : memref<4x32x8xbf16, #tpu.memory_space<vmem>>, vector<4x32x8xbf16>
    "tpu.trace_start"() <{level = 10 : i32, message = "hte,hed->htd"}> : () -> ()
    %cst_17 = arith.constant dense<0.000000e+00> : vector<4x8x8xf32>
    %36 = tpu.matmul %34, %35, %cst_17 {dimension_numbers = #tpu.dot_dimension_numbers<[2], [1], [1], [2], [0, 0, 0, 1, 1, 2], [0], [0]>} : vector<4x8x32xbf16>, vector<4x32x8xbf16>, vector<4x8x8xf32> -> vector<4x8x8xf32>
    "tpu.trace_stop"() : () -> ()
    %c0_18 = arith.constant 0 : index
    %c0_19 = arith.constant 0 : index
    %c0_20 = arith.constant 0 : index
    %37 = vector.load %arg3[%c0_18, %c0_19, %c0_20] : memref<4x32x8xbf16, #tpu.memory_space<vmem>>, vector<4x32x8xbf16>
    "tpu.trace_start"() <{level = 10 : i32, message = "hte,hed->htd"}> : () -> ()
    %cst_21 = arith.constant dense<0.000000e+00> : vector<4x8x8xf32>
    %38 = tpu.matmul %34, %37, %cst_21 {dimension_numbers = #tpu.dot_dimension_numbers<[2], [1], [1], [2], [0, 0, 0, 1, 1, 2], [0], [0]>} : vector<4x8x32xbf16>, vector<4x32x8xbf16>, vector<4x8x8xf32> -> vector<4x8x8xf32>
    "tpu.trace_stop"() : () -> ()
    %c0_22 = arith.constant 0 : index
    %c0_23 = arith.constant 0 : index
    %c0_24 = arith.constant 0 : index
    %39 = vector.load %arg4[%c0_22, %c0_23, %c0_24] : memref<4x32x8xbf16, #tpu.memory_space<vmem>>, vector<4x32x8xbf16>
    "tpu.trace_start"() <{level = 10 : i32, message = "hte,hed->htd"}> : () -> ()
    %cst_25 = arith.constant dense<0.000000e+00> : vector<4x8x8xf32>
    %40 = tpu.matmul %34, %39, %cst_25 {dimension_numbers = #tpu.dot_dimension_numbers<[2], [1], [1], [2], [0, 0, 0, 1, 1, 2], [0], [0]>} : vector<4x8x32xbf16>, vector<4x32x8xbf16>, vector<4x8x8xf32> -> vector<4x8x8xf32>
    "tpu.trace_stop"() : () -> ()
    %41 = tpu.iota {dimensions = array<i32: 0>} : vector<8x8xi32>
    %42 = tpu.iota {dimensions = array<i32: 1>} : vector<8x8xi32>
    %43 = arith.cmpi sge, %41, %42 : vector<8x8xi32>
    %cst_26 = arith.constant 0.000000e+00 : f32
    %cst_27 = arith.constant -1.000000e+30 : f32
    %44 = vector.broadcast %cst_26 : f32 to vector<8x8xf32>
    %45 = vector.broadcast %cst_27 : f32 to vector<8x8xf32>
    %46 = arith.select %43, %44, %45 : vector<8x8xi1>, vector<8x8xf32>
    %47 = vector.shape_cast %46 : vector<8x8xf32> to vector<1x8x8xf32>
    %48 = arith.truncf %36 : vector<4x8x8xf32> to vector<4x8x8xbf16>
    %49 = arith.truncf %38 : vector<4x8x8xf32> to vector<4x8x8xbf16>
    "tpu.trace_start"() <{level = 10 : i32, message = "htd,hsd->hts"}> : () -> ()
    %cst_28 = arith.constant dense<0.000000e+00> : vector<4x8x8xf32>
    %50 = tpu.matmul %48, %49, %cst_28 {dimension_numbers = #tpu.dot_dimension_numbers<[2], [2], [1], [1], [0, 0, 0, 1, 1, 1], [0], [0]>} : vector<4x8x8xbf16>, vector<4x8x8xbf16>, vector<4x8x8xf32> -> vector<4x8x8xf32>
    "tpu.trace_stop"() : () -> ()
    %cst_29 = arith.constant 0.840896427 : f32
    %51 = vector.broadcast %cst_29 : f32 to vector<4x8x8xf32>
    %52 = arith.mulf %50, %51 : vector<4x8x8xf32>
    %53 = vector.broadcast %47 : vector<1x8x8xf32> to vector<4x8x8xf32>
    %54 = arith.addf %52, %53 : vector<4x8x8xf32>
    %cst_30 = arith.constant dense<0xFF800000> : vector<4x8xf32>
    %55 = vector.multi_reduction <maximumf>, %54, %cst_30 [2] : vector<4x8x8xf32> to vector<4x8xf32>
    %56 = vector.shape_cast %55 : vector<4x8xf32> to vector<4x8x1xf32>
    %57 = vector.broadcast %56 : vector<4x8x1xf32> to vector<4x8x8xf32>
    %58 = arith.subf %54, %57 : vector<4x8x8xf32>
    %59 = math.exp %58 : vector<4x8x8xf32>
    %cst_31 = arith.constant dense<0.000000e+00> : vector<4x8xf32>
    %60 = vector.multi_reduction <add>, %59, %cst_31 [2] : vector<4x8x8xf32> to vector<4x8xf32>
    %61 = vector.shape_cast %60 : vector<4x8xf32> to vector<4x8x1xf32>
    %62 = tpu.reciprocal %61 : vector<4x8x1xf32> -> vector<4x8x1xf32>
    %63 = vector.broadcast %62 : vector<4x8x1xf32> to vector<4x8x8xf32>
    %64 = arith.mulf %59, %63 : vector<4x8x8xf32>
    %65 = arith.truncf %64 : vector<4x8x8xf32> to vector<4x8x8xbf16>
    %66 = arith.truncf %40 : vector<4x8x8xf32> to vector<4x8x8xbf16>
    "tpu.trace_start"() <{level = 10 : i32, message = "hts,hsd->htd"}> : () -> ()
    %cst_32 = arith.constant dense<0.000000e+00> : vector<4x8x8xf32>
    %67 = tpu.matmul %65, %66, %cst_32 {dimension_numbers = #tpu.dot_dimension_numbers<[2], [1], [1], [2], [0, 0, 0, 1, 1, 2], [0], [0]>} : vector<4x8x8xbf16>, vector<4x8x8xbf16>, vector<4x8x8xf32> -> vector<4x8x8xf32>
    "tpu.trace_stop"() : () -> ()
    %68 = arith.truncf %67 : vector<4x8x8xf32> to vector<4x8x8xbf16>
    %c0_33 = arith.constant 0 : index
    %c0_34 = arith.constant 0 : index
    %c0_35 = arith.constant 0 : index
    %69 = vector.load %arg5[%c0_33, %c0_34, %c0_35] : memref<4x8x32xbf16, #tpu.memory_space<vmem>>, vector<4x8x32xbf16>
    "tpu.trace_start"() <{level = 10 : i32, message = "htd,hde->hte"}> : () -> ()
    %cst_36 = arith.constant dense<0.000000e+00> : vector<4x8x32xf32>
    %70 = tpu.matmul %68, %69, %cst_36 {dimension_numbers = #tpu.dot_dimension_numbers<[2], [1], [1], [2], [0, 0, 0, 1, 1, 2], [0], [0]>} : vector<4x8x8xbf16>, vector<4x8x32xbf16>, vector<4x8x32xf32> -> vector<4x8x32xf32>
    "tpu.trace_stop"() : () -> ()
    %cst_37 = arith.constant dense<0.000000e+00> : vector<8x32xf32>
    %71 = vector.multi_reduction <add>, %70, %cst_37 [0] : vector<4x8x32xf32> to vector<8x32xf32>
    %72 = vector.broadcast %6 : vector<1x32xf32> to vector<8x32xf32>
    %73 = arith.addf %71, %72 : vector<8x32xf32>
    %74 = arith.addf %1, %73 : vector<8x32xf32>
    %cst_38 = arith.constant dense<0.000000e+00> : vector<8xf32>
    %75 = vector.multi_reduction <add>, %74, %cst_38 [1] : vector<8x32xf32> to vector<8xf32>
    %76 = vector.shape_cast %75 : vector<8xf32> to vector<8x1xf32>
    %cst_39 = arith.constant 3.200000e+01 : f32
    %77 = vector.broadcast %cst_39 : f32 to vector<8x1xf32>
    %78 = arith.divf %76, %77 : vector<8x1xf32>
    %79 = vector.broadcast %78 : vector<8x1xf32> to vector<8x32xf32>
    %80 = arith.subf %74, %79 : vector<8x32xf32>
    %81 = arith.mulf %80, %80 : vector<8x32xf32>
    %cst_40 = arith.constant dense<0.000000e+00> : vector<8xf32>
    %82 = vector.multi_reduction <add>, %81, %cst_40 [1] : vector<8x32xf32> to vector<8xf32>
    %83 = vector.shape_cast %82 : vector<8xf32> to vector<8x1xf32>
    %cst_41 = arith.constant 3.200000e+01 : f32
    %84 = vector.broadcast %cst_41 : f32 to vector<8x1xf32>
    %85 = arith.divf %83, %84 : vector<8x1xf32>
    %86 = vector.broadcast %78 : vector<8x1xf32> to vector<8x32xf32>
    %87 = arith.subf %74, %86 : vector<8x32xf32>
    %cst_42 = arith.constant 9.99999974E-6 : f32
    %88 = vector.broadcast %cst_42 : f32 to vector<8x1xf32>
    %89 = arith.addf %85, %88 : vector<8x1xf32>
    %90 = math.rsqrt %89 : vector<8x1xf32>
    %91 = vector.broadcast %90 : vector<8x1xf32> to vector<8x32xf32>
    %92 = arith.mulf %87, %91 : vector<8x32xf32>
    %93 = vector.broadcast %4 : vector<1x32xf32> to vector<8x32xf32>
    %94 = arith.mulf %92, %93 : vector<8x32xf32>
    %95 = vector.broadcast %5 : vector<1x32xf32> to vector<8x32xf32>
    %96 = arith.addf %94, %95 : vector<8x32xf32>
    %97 = arith.truncf %96 : vector<8x32xf32> to vector<8x32xbf16>
    %c0_43 = arith.constant 0 : index
    %c0_44 = arith.constant 0 : index
    %98 = vector.load %arg6[%c0_43, %c0_44] : memref<32x128xbf16, #tpu.memory_space<vmem>>, vector<32x128xbf16>
    %cst_45 = arith.constant dense<0.000000e+00> : vector<8x128xf32>
    %99 = tpu.matmul %97, %98, %cst_45 {dimension_numbers = #tpu.dot_dimension_numbers<[1], [0], [0], [1], [0, 0, 1, 1], [], []>} : vector<8x32xbf16>, vector<32x128xbf16>, vector<8x128xf32> -> vector<8x128xf32>
    %100 = vector.broadcast %8 : vector<1x128xf32> to vector<8x128xf32>
    %101 = arith.addf %99, %100 : vector<8x128xf32>
    %cst_46 = arith.constant 0.000000e+00 : f32
    %102 = vector.broadcast %cst_46 : f32 to vector<8x128xf32>
    %103 = arith.maximumf %101, %102 : vector<8x128xf32>
    %104 = arith.truncf %103 : vector<8x128xf32> to vector<8x128xbf16>
    %c0_47 = arith.constant 0 : index
    %c0_48 = arith.constant 0 : index
    %105 = vector.load %arg7[%c0_47, %c0_48] : memref<128x32xbf16, #tpu.memory_space<vmem>>, vector<128x32xbf16>
    %cst_49 = arith.constant dense<0.000000e+00> : vector<8x32xf32>
    %106 = tpu.matmul %104, %105, %cst_49 {dimension_numbers = #tpu.dot_dimension_numbers<[1], [0], [0], [1], [0, 0, 1, 1], [], []>} : vector<8x128xbf16>, vector<128x32xbf16>, vector<8x32xf32> -> vector<8x32xf32>
    %107 = vector.broadcast %7 : vector<1x32xf32> to vector<8x32xf32>
    %108 = arith.addf %106, %107 : vector<8x32xf32>
    %109 = arith.addf %74, %108 : vector<8x32xf32>
    %c0_50 = arith.constant 0 : index
    %c0_51 = arith.constant 0 : index
    %c0_52 = arith.constant 0 : index
    %110 = vector.load %arg9[%c0_50, %c0_51, %c0_52] : memref<1x8x32xf32, #tpu.memory_space<vmem>>, vector<1x8x32xf32>
    %111 = vector.shape_cast %110 : vector<1x8x32xf32> to vector<8x32xf32>
    %112 = vector.shape_cast %109 : vector<8x32xf32> to vector<1x8x32xf32>
    tpu.vector_store %arg9[%c0_50, %c0_51, %c0_52], %112 {strides = array<i32>} : memref<1x8x32xf32, #tpu.memory_space<vmem>>, vector<1x8x32xf32>,
    return
  }
  func.func @transform_0(%arg0: i32) -> (i32, i32, i32) {
    %c0_i32 = arith.constant 0 : i32
    %c0_i32_0 = arith.constant 0 : i32
    %c0_i32_1 = arith.constant 0 : i32
    return %arg0, %c0_i32, %c0_i32_0 : i32, i32, i32
  }
  func.func @transform_1(%arg0: i32) -> (i32, i32, i32) {
    %c0_i32 = arith.constant 0 : i32
    %c0_i32_0 = arith.constant 0 : i32
    %c0_i32_1 = arith.constant 0 : i32
    %c0_i32_2 = arith.constant 0 : i32
    return %c0_i32, %c0_i32_0, %c0_i32_1 : i32, i32, i32
  }
  func.func @transform_2(%arg0: i32) -> (i32, i32, i32) {
    %c0_i32 = arith.constant 0 : i32
    %c0_i32_0 = arith.constant 0 : i32
    %c0_i32_1 = arith.constant 0 : i32
    %c0_i32_2 = arith.constant 0 : i32
    return %c0_i32, %c0_i32_0, %c0_i32_1 : i32, i32, i32
  }
  func.func @transform_3(%arg0: i32) -> (i32, i32, i32) {
    %c0_i32 = arith.constant 0 : i32
    %c0_i32_0 = arith.constant 0 : i32
    %c0_i32_1 = arith.constant 0 : i32
    %c0_i32_2 = arith.constant 0 : i32
    return %c0_i32, %c0_i32_0, %c0_i32_1 : i32, i32, i32
  }
  func.func @transform_4(%arg0: i32) -> (i32, i32, i32) {
    %c0_i32 = arith.constant 0 : i32
    %c0_i32_0 = arith.constant 0 : i32
    %c0_i32_1 = arith.constant 0 : i32
    %c0_i32_2 = arith.constant 0 : i32
    return %c0_i32, %c0_i32_0, %c0_i32_1 : i32, i32, i32
  }
  func.func @transform_5(%arg0: i32) -> (i32, i32) {
    %c0_i32 = arith.constant 0 : i32
    %c0_i32_0 = arith.constant 0 : i32
    %c0_i32_1 = arith.constant 0 : i32
    return %c0_i32, %c0_i32_0 : i32, i32
  }
  func.func @transform_6(%arg0: i32) -> (i32, i32) {
    %c0_i32 = arith.constant 0 : i32
    %c0_i32_0 = arith.constant 0 : i32
    %c0_i32_1 = arith.constant 0 : i32
    return %c0_i32, %c0_i32_0 : i32, i32
  }
  func.func @transform_7(%arg0: i32) -> (i32, i32) {
    %c0_i32 = arith.constant 0 : i32
    %c0_i32_0 = arith.constant 0 : i32
    %c0_i32_1 = arith.constant 0 : i32
    return %c0_i32, %c0_i32_0 : i32, i32
  }
  func.func @transform_8(%arg0: i32) -> (i32, i32, i32) {
    %c0_i32 = arith.constant 0 : i32
    %c0_i32_0 = arith.constant 0 : i32
    %c0_i32_1 = arith.constant 0 : i32
    return %arg0, %c0_i32, %c0_i32_0 : i32, i32, i32
  }
}

</mosaic_0001>

<bundles_post_ra>
// kernel: transformer_block.1
= control target key start
LH: loop header
LB: loop body
LE: loop exit
PB: predicated region body
PF: predicated region fallthrough
CT: control target
= control target key end

     0   :  { %13 = vsyncpa [#allocation3], 0  ;;  %s2905_s0 = inlined_call_operand.vmem [shape: f32[2,8,32], index: 0, kind: input, shape index: {}]   ;;  %s2906_s1 = inlined_call_operand.vmem [shape: bf16[4,32,8], index: 1, kind: input, shape index: {}]   ;;  %s2907_s2 = inlined_call_operand.vmem [shape: bf16[4,32,8], index: 2, kind: input, shape index: {}]   ;;  %s2908_s3 = inlined_call_operand.vmem [shape: bf16[4,32,8], index: 3, kind: input, shape index: {}]   ;;  %s2909_s4 = inlined_call_operand.vmem [shape: bf16[4,8,32], index: 4, kind: input, shape index: {}]   ;;  %s2910_s5 = inlined_call_operand.vmem [shape: bf16[32,128], index: 5, kind: input, shape index: {}]   ;;  %s2911_s6 = inlined_call_operand.vmem [shape: bf16[128,32], index: 6, kind: input, shape index: {}]   ;;  %s2912_s7 = inlined_call_operand.vmem [shape: f32[8,128], index: 7, kind: input, shape index: {}]   ;;  %s2913_s8 = inlined_call_operand.hbm [shape: f32[2,8,32], index: 8, kind: output, shape index: {}]  }
   0x1   :  { %15 = vsyncpa [#allocation3 + $0x1], 0  ;;  %s2483_s27 = smov 0   ;;  %s2485_s28 = smov 0  }
   0x2   :  { %s2487_s29 = smov 0   ;;  %s2489_s30 = smov 0  }
   0x3 LB: > { %s2504_s9 = sadd.s32 4294967295, %s2432_s30   ;;  %s1932_s10 = sadd.s32 4294967294, %s2432_s30   ;;  %s2432_s30 = sphi %s2489_s30, %s2919_s30   ;;  %s2428_s29 = sphi %s2487_s29, %s2918_s29   ;;  %s2424_s28 = sphi %s2485_s28, %s2917_s28   ;;  %s2420_s27 = sphi %s2483_s27, %s2916_s27  }
   0x4   : > { %s2508_s11 = sadd.s32 1, %s2432_s30   ;;  %s201_s12 = sadd.s32 1, %s2428_s29 }
   0x5   : > { %s198_s13 = ssub.s32 %s2432_s30, %s2508_s11  ;;  %p211_p0 = scmp.ne.s32.totalorder %s2428_s29, %s2424_s28 }
   0x6   : > { %p199_p1 = scmp.eq.s32.totalorder %s198_s13, 0  ;;  %p212_p2 = scmp.eq.s32.totalorder %s2504_s9, 1 }
   0x7   : > { %p217_p3 = scmp.ne.s32.totalorder %s2424_s28, %s2420_s27  ;;  %p218_p4 = scmp.eq.s32.totalorder %s1932_s10, 1 }
   0x8   : > { %s2519_s14 = scalar_select %p199_p1, %s2428_s29, %s201_s12  }
   0x9   : > { %p2521_p5 = por %p212_p2, %p211_p0  ;;  %p2525_p6 = por %p218_p4, %p217_p3 }
   0xa   : > { %p1935_p7 = scmp.ge.s32.totalorder %s2432_s30, 1  ;;  %p264_p8 = scmp.lt.s32.totalorder %s2432_s30, 3 }
   0xc   : > { %p265_p9 = pnand %p1935_p7, %p264_p8 }
   0xd   : > { %p297_p10 = scmp.lt.s32.totalorder (!%p265_p9), %s2504_s9, 1  ;;  %s294_s19 = sand.u32 (!%p265_p9), 1, %s2424_s28  }
   0xe   : > { %268 = sbr.rel (%p265_p9) target bundleno = 2199 (0x897), region = 52  ;;  %s1936_s20 = sshll.u32 (!%p265_p9), %s294_s19, 3 }
   0xf   : > { %s2005_s23 = sshll.u32 (!%p265_p9), %s2504_s9, 7  ;;  %s296_s24 = scalar_lea.vmem (!%p265_p9), [#allocation2], %s1936_s20 }
  0x10   : > { %s1873_s25 = sshll.u32 (!%p265_p9), %s296_s24, 4  ;;  %s2863_s12 = scalar_lea.hbm (!%p265_p9), %s2913_s8, %s2005_s23  ;;  %s2865_s25 = int_to_ptr.vmem [resolvable:$true] %s1873_s25 }
  0x11   : > { %s2372_s13 = scalar_lea.vmem (!%p265_p9), %s2865_s25, 128 }
  0x12   : > { %p2373_p11 = scmp.ne.s32.totalorder (!%p265_p9), %s2865_s25, %s2372_s13 }
  0x13   : > { %s298_s17 = scalar_select %p297_p10, %s2504_s9, 1  ;;  %vm310_vm0 = vcmask 261120   ;;  %v2318_v7 = vld [vmem:[%s2906_s1 + $0x8] sm:$0xff]   ;;  %v2319_v8 = vld [vmem:[%s2906_s1 + $0x38] sm:$0xff]   ;;  %v2434_v9 = vmov 0.0   ;;  %v2320_v10 = vld [vmem:[%s2906_s1] sm:$0xff]  }
  0x14   : > { %2080 = vmatprep.subr.bf16.mxu0 %v2434_v9  ;;  %2104 = vmatprep.subr.bf16.mxu1 %v2434_v9  ;;  %v2321_v11 = vld [vmem:[%s2906_s1 + $0x30] sm:$0xff]   ;;  %vm2435_vm1 = vmmov 0   ;;  %v1938_v16 = vld [vmem:[%s2912_s7] ss:$0 sm:$0xff]  ;;  %v1939_v18 = vld [vmem:[%s2912_s7 + $0x1] ss:$0 sm:$0xff]  ;;  %p2374_p12 = pnand %p2373_p11, %p2521_p5 }
  0x15   : > { %s1937_s18 = sshll.u32 %s298_s17, 3  ;;  %2081 = vmatpush3.bf16.msra.mxu0 %v2318_v7  ;;  %2105 = vmatpush3.bf16.msra.mxu1 %v2319_v8  ;;  %v2322_v21 = vld [vmem:[%s2906_s1 + $0x18] sm:$0xff]   ;;  %v2324_v24 = vld [vmem:[%s2906_s1 + $0x10] sm:$0xff]   ;;  %v2326_v26 = vld [vmem:[%s2906_s1 + $0x28] sm:$0xff]   ;;  %vm1025_vm2 = vcmask 64512   ;;  %vm1273_vm3 = vcmask 1043456  }
  0x16   : > { %s300_s21 = scalar_lea.vmem %s2905_s0, %s1937_s18  ;;  %2082 = vmatprep.subr.bf16.mxu0 %v2434_v9  ;;  %2106 = vmatprep.subr.bf16.mxu1 %v2434_v9  ;;  %v2323_v22 = vld [vmem:[%s2907_s2 + $0x18] sm:$0xff]   ;;  %v2325_v25 = vld [vmem:[%s2907_s2 + $0x10] sm:$0xff]   ;;  %v2328_v28 = vld [vmem:[%s2906_s1 + $0x20] sm:$0xff]   ;;  %s1860_s9 = scalar_lea.sflag [#allocation3], %s294_s19 }
  0x17   : > { %v2536_v0 = vld [vmem:[%s300_s21] sm:$0xff]  ;;  %2084 = vmatprep.mubr.msk.bf16.mxu0 %vm2435_vm1, %v2434_v9  ;;  %2108 = vmatprep.mubr.msk.bf16.mxu1 %vm2435_vm1, %v2434_v9  ;;  %v2327_v27 = vld [vmem:[%s2907_s2 + $0x38] sm:$0xff]   ;;  %v2329_v29 = vld [vmem:[%s2907_s2 + $0x30] sm:$0xff]   ;;  %p2375_p13 = pneg %p2374_p12  ;;  %s2437_s17 = smov [#allocation2]  }
  0x18   : > { %v311_v1 = vsel %vm310_vm0, %v2536_v0, 0.0  ;;  %v2330_v30 = vld [vmem:[%s2907_s2 + $0x8] sm:$0xff]   ;;  %v2331_v31 = vld [vmem:[%s2908_s3 + $0x18] sm:$0xff]   ;;  %v2332_v32 = vld [vmem:[%s2907_s2] sm:$0xff]   ;;  %s2376_s18 = sshll.u32 %s2437_s17, 4  ;;  %s2377_s18 = int_to_ptr.vmem [resolvable:$false] %s2376_s18 }
  0x19   : > { %312 = vadd.xlane.f32.xlu0 %v311_v1  ;;  %2083 = vmatpush3.bf16.msra.mxu0 %v2320_v10  ;;  %v2333_v33 = vld [vmem:[%s2908_s3 + $0x10] sm:$0xff]   ;;  %v2334_v34 = vld [vmem:[%s2907_s2 + $0x28] sm:$0xff]   ;;  %v2335_v35 = vld [vmem:[%s2908_s3 + $0x38] sm:$0xff]   ;;  %s2378_s20 = scalar_lea.vmem %s2377_s18, 256  ;;  %p2379_p0 = scmp.lt.s32.totalorder %s2865_s25, %s2377_s18 }
  0x1a   : > { %2107 = vmatpush3.bf16.msra.mxu1 %v2321_v11  ;;  %2088 = vmatprep.subr.bf16.mxu0 %v2434_v9  ;;  %v2336_v36 = vld [vmem:[%s2907_s2 + $0x20] sm:$0xff]   ;;  %v2337_v37 = vld [vmem:[%s2908_s3 + $0x30] sm:$0xff]   ;;  %v2338_v38 = vld [vmem:[%s2908_s3 + $0x8] sm:$0xff]   ;;  %p2380_p1 = scmp.lt.s32.totalorder %s2378_s20, %s2372_s13 }
  0x1b   : > { %2120 = vmatprep.subr.bf16.mxu1 %v2434_v9  ;;  %v2339_v39 = vld [vmem:[%s2908_s3] sm:$0xff]   ;;  %v2340_v40 = vld [vmem:[%s2908_s3 + $0x28] sm:$0xff]  }
  0x1c   : > { %v2341_v41 = vld [vmem:[%s2908_s3 + $0x20] sm:$0xff]   ;;  %p2381_p2 = por %p2380_p1, %p2379_p0 }
  0x1e   : > { %p2382_p3 = pnand %p2381_p2, %p2375_p13 }
  0xa2   : > { %v313_v2 = vpop.xlane.xlu0 %312 }
  0xa3   : > { %v315_v3 = vmul.f32 0.03125, %v313_v2 }
  0xa5   : > { %v316_v4 = vsub.f32 %v2536_v0, %v315_v3 }
  0xa7   : > { %v317_v5 = vmul.f32 %v316_v4, %v316_v4 }
  0xa9   : > { %v318_v6 = vsel %vm310_vm0, %v317_v5, 0.0 }
  0xaa   : > { %319 = vadd.xlane.f32.xlu0 %v318_v6 }
 0x133   : > { %v320_v12 = vpop.xlane.xlu0 %319 }
 0x134   : > { %v321_v13 = vmul.f32 0.03125, %v320_v12 }
 0x136   : > { %v322_v14 = vadd.f32 1e-05, %v321_v13 }
 0x138   : > { %2352 = vrsqrt.f32 %v322_v14 }
 0x145   : > { %v2353_v15 = vpop.eup %2352 }
 0x146   : > { %v324_v17 = vmul.f32 %v2353_v15, %v316_v4 }
 0x148   : > { %v329_v19 = vmul.f32 %v1938_v16, %v324_v17 }
 0x14a   : > { %v334_v20 = vadd.f32 %v1939_v18, %v329_v19 }
 0x14c   : > { %v2576_v23 = vpack.c.bf16 %v334_v20, %v334_v20 }
 0x14e   : > { %2085 = vmatmul.mubr.msk.bf16.vlgmr.msra.gmra.mxu0 %vm310_vm0, %v2576_v23  ;;  %2109 = vmatmul.mubr.msk.bf16.vlgmr.msra.gmra.mxu1 %vm310_vm0, %v2576_v23 }
 0x14f   : > { %2089 = vmatpush3.bf16.msra.mxu0 %v2322_v21  ;;  %2121 = vmatpush3.bf16.msra.mxu1 %v2323_v22 }
 0x150   : > { %2090 = vmatprep.subr.bf16.mxu0 %v2434_v9  ;;  %2122 = vmatprep.subr.bf16.mxu1 %v2434_v9 }
 0x151   : > { %2092 = vmatprep.mubr.msk.bf16.mxu0 %vm2435_vm1, %v2434_v9  ;;  %2124 = vmatprep.mubr.msk.bf16.mxu1 %vm2435_vm1, %v2434_v9 }
 0x153   : > { %2091 = vmatpush3.bf16.msra.mxu0 %v2324_v24  ;;  %2123 = vmatpush3.bf16.msra.mxu1 %v2325_v25 }
 0x154   : > { %2096 = vmatprep.subr.bf16.mxu0 %v2434_v9  ;;  %2136 = vmatprep.subr.bf16.mxu1 %v2434_v9 }
 0x156   : > { %2093 = vmatmul.mubr.msk.bf16.vlgmr.msra.gmra.mxu0 %vm310_vm0, %v2576_v23  ;;  %2125 = vmatmul.mubr.msk.bf16.vlgmr.msra.gmra.mxu1 %vm310_vm0, %v2576_v23 }
 0x157   : > { %2097 = vmatpush3.bf16.msra.mxu0 %v2326_v26  ;;  %2137 = vmatpush3.bf16.msra.mxu1 %v2327_v27 }
 0x158   : > { %2098 = vmatprep.subr.bf16.mxu0 %v2434_v9  ;;  %2138 = vmatprep.subr.bf16.mxu1 %v2434_v9 }
 0x159   : > { %2100 = vmatprep.mubr.msk.bf16.mxu0 %vm2435_vm1, %v2434_v9  ;;  %2140 = vmatprep.mubr.msk.bf16.mxu1 %vm2435_vm1, %v2434_v9 }
 0x15b   : > { %2099 = vmatpush3.bf16.msra.mxu0 %v2328_v28  ;;  %2139 = vmatpush3.bf16.msra.mxu1 %v2329_v29 }
 0x15c   : > { %2112 = vmatprep.subr.bf16.mxu0 %v2434_v9  ;;  %2152 = vmatprep.subr.bf16.mxu1 %v2434_v9 }
 0x15e   : > { %2101 = vmatmul.mubr.msk.bf16.vlgmr.msra.gmra.mxu0 %vm310_vm0, %v2576_v23  ;;  %2141 = vmatmul.mubr.msk.bf16.vlgmr.msra.gmra.mxu1 %vm310_vm0, %v2576_v23 }
 0x15f   : > { %2113 = vmatpush3.bf16.msra.mxu0 %v2330_v30  ;;  %2153 = vmatpush3.bf16.msra.mxu1 %v2331_v31 }
 0x160   : > { %2114 = vmatprep.subr.bf16.mxu0 %v2434_v9  ;;  %2154 = vmatprep.subr.bf16.mxu1 %v2434_v9 }
 0x161   : > { %2116 = vmatprep.mubr.msk.bf16.mxu0 %vm2435_vm1, %v2434_v9  ;;  %2156 = vmatprep.mubr.msk.bf16.mxu1 %vm2435_vm1, %v2434_v9 }
 0x163   : > { %2115 = vmatpush3.bf16.msra.mxu0 %v2332_v32  ;;  %2155 = vmatpush3.bf16.msra.mxu1 %v2333_v33 }
 0x164   : > { %2128 = vmatprep.subr.bf16.mxu0 %v2434_v9  ;;  %2168 = vmatprep.subr.bf16.mxu1 %v2434_v9 }
 0x166   : > { %2117 = vmatmul.mubr.msk.bf16.vlgmr.msra.gmra.mxu0 %vm310_vm0, %v2576_v23  ;;  %2157 = vmatmul.mubr.msk.bf16.vlgmr.msra.gmra.mxu1 %vm310_vm0, %v2576_v23 }
 0x167   : > { %2129 = vmatpush3.bf16.msra.mxu0 %v2334_v34  ;;  %2169 = vmatpush3.bf16.msra.mxu1 %v2335_v35 }
 0x168   : > { %2130 = vmatprep.subr.bf16.mxu0 %v2434_v9  ;;  %2170 = vmatprep.subr.bf16.mxu1 %v2434_v9 }
 0x169   : > { %2132 = vmatprep.mubr.msk.bf16.mxu0 %vm2435_vm1, %v2434_v9  ;;  %2172 = vmatprep.mubr.msk.bf16.mxu1 %vm2435_vm1, %v2434_v9 }
 0x16b   : > { %2131 = vmatpush3.bf16.msra.mxu0 %v2336_v36  ;;  %2171 = vmatpush3.bf16.msra.mxu1 %v2337_v37 }
 0x16c   : > { %2144 = vmatprep.subr.bf16.mxu0 %v2434_v9  ;;  %2182 = vmatprep.subr.bf16.mxu1 %v2434_v9 }
 0x16e   : > { %2133 = vmatmul.mubr.msk.bf16.vlgmr.msra.gmra.mxu0 %vm310_vm0, %v2576_v23  ;;  %2173 = vmatmul.mubr.msk.bf16.vlgmr.msra.gmra.mxu1 %vm310_vm0, %v2576_v23 }
 0x16f   : > { %2145 = vmatpush3.bf16.msra.mxu0 %v2338_v38  ;;  %2148 = vmatprep.mubr.msk.bf16.mxu0 %vm2435_vm1, %v2434_v9 }
 0x170   : > { %2146 = vmatprep.subr.bf16.mxu0 %v2434_v9  ;;  %2184 = vmatprep.mubr.msk.bf16.mxu1 %vm2435_vm1, %v2434_v9 }
 0x173   : > { %2147 = vmatpush3.bf16.msra.mxu0 %v2339_v39 }
 0x174   : > { %2160 = vmatprep.subr.bf16.mxu0 %v2434_v9 }
 0x176   : > { %2149 = vmatmul.mubr.msk.bf16.vlgmr.msra.gmra.mxu0 %vm310_vm0, %v2576_v23 }
 0x177   : > { %2161 = vmatpush3.bf16.msra.mxu0 %v2340_v40  ;;  %2164 = vmatprep.mubr.msk.bf16.mxu0 %vm2435_vm1, %v2434_v9 }
 0x178   : > { %2162 = vmatprep.subr.bf16.mxu0 %v2434_v9 }
 0x17b   : > { %2163 = vmatpush3.bf16.msra.mxu0 %v2341_v41 }
 0x17c   : > { %2176 = vmatprep.subr.bf16.mxu0 %v2434_v9 }
 0x17e   : > { %2165 = vmatmul.mubr.msk.bf16.vlgmr.msra.gmra.mxu0 %vm310_vm0, %v2576_v23 }
 0x17f   : > { %2178 = vmatprep.mubr.msk.bf16.mxu0 %vm2435_vm1, %v2434_v9 }
 0x20e   : > { %v2700_v42 = vpop.f32.mrf.mxu0  ;;  %v557_v43 = vpop.f32.mrf.mxu1 }
 0x20f   : > { %v1020_v11 = vpack.c.bf16 %v557_v43, %v557_v43  ;;  %v1017_v24 = vpack.c.bf16 %v2700_v42, %v2700_v42 }
 0x210   : > { %v2086_v44 = vpop.f32.mrf.mxu0  ;;  %v2110_v45 = vpop.f32.mrf.mxu1 }
 0x212   : > { %v404_v46 = vpop.f32.mrf.mxu0  ;;  %v560_v47 = vpop.f32.mrf.mxu1 }
 0x214   : > { %v2087_v48 = vpop.f32.mrf.mxu0  ;;  %v2111_v49 = vpop.f32.mrf.mxu1 }
 0x215   : > { %v1011_v48 = vlaneseq }
 0x216   : > { %v453_v50 = vpop.f32.mrf.mxu0  ;;  %v677_v51 = vpop.f32.mrf.mxu1 }
 0x217   : > { %v1022_v52 = vpack.c.bf16 %v677_v51, %v677_v51  ;;  %v1018_v62 = vpack.c.bf16 %v453_v50, %v453_v50  ;;  %v1012_v51 = vshrl.u32 %v1011_v48, 7 }
 0x218   : > { %v2094_v53 = vpop.f32.mrf.mxu0  ;;  %v2126_v54 = vpop.f32.mrf.mxu1 }
 0x219   : > { %v1076_v55 = vsel %vm1025_vm2, %v1022_v52, 0  ;;  %v1014_v52 = vand.u32 127, %v1011_v48 }
 0x21a   : > { %v456_v56 = vpop.f32.mrf.mxu0  ;;  %v680_v57 = vpop.f32.mrf.mxu1  ;;  %2183 = vmatpush3.bf16.xpose.msra.mxu1 %v1076_v55 }
 0x21b   : > { %2194 = vmatprep.subr.bf16.mxu1 %v2434_v9  ;;  %vm1015_vm4 = vcmp.ge.s32.totalorder %v1012_v51, %v1014_v52 }
 0x21c   : > { %v2095_v58 = vpop.f32.mrf.mxu0  ;;  %v2127_v59 = vpop.f32.mrf.mxu1 }
 0x21d   : > { %v2436_v59 = vmov -1e+30  }
 0x21e   : > { %v505_v60 = vpop.f32.mrf.mxu0  ;;  %v781_v61 = vpop.f32.mrf.mxu1 }
 0x21f   : > { %v1024_v63 = vpack.c.bf16 %v781_v61, %v781_v61  ;;  %v1019_v34 = vpack.c.bf16 %v505_v60, %v505_v60  ;;  %v1016_v60 = vsel %vm1015_vm4, 0.0, %v2436_v59  ;;  %v1461_v59 = vld [vmem:[%s2909_s4 + $0x8] sm:$0xf] }
 0x220   : > { %v2102_v1 = vpop.f32.mrf.mxu0  ;;  %v2142_v2 = vpop.f32.mrf.mxu1 }
 0x221   : > { %v1168_v3 = vsel %vm1025_vm2, %v1024_v63, 0  ;;  %2185 = vmatmul.mubr.msk.bf16.vlgmr.msra.gmra.mxu1 %vm1025_vm2, %v1018_v62 }
 0x222   : > { %v508_v4 = vpop.f32.mrf.mxu0  ;;  %v784_v5 = vpop.f32.mrf.mxu1  ;;  %2195 = vmatpush3.bf16.xpose.msra.mxu1 %v1168_v3  ;;  %2196 = vmatprep.mubr.msk.bf16.mxu1 %vm2435_vm1, %v2434_v9 }
 0x223   : > { %2206 = vmatprep.subr.bf16.mxu1 %v2434_v9 }
 0x224   : > { %v2103_v6 = vpop.f32.mrf.mxu0  ;;  %v2143_v7 = vpop.f32.mrf.mxu1 }
 0x226   : > { %v625_v8 = vpop.f32.mrf.mxu0  ;;  %v901_v10 = vpop.f32.mrf.mxu1 }
 0x227   : > { %v1021_v12 = vpack.c.bf16 %v625_v8, %v625_v8  ;;  %v1267_v13 = vpack.c.bf16 %v901_v10, %v901_v10 }
 0x228   : > { %v2118_v14 = vpop.f32.mrf.mxu0  ;;  %v2158_v15 = vpop.f32.mrf.mxu1 }
 0x229   : > { %v1030_v16 = vsel %vm1025_vm2, %v1021_v12, 0  ;;  %v1321_v17 = vsel %vm1273_vm3, %v1267_v13, 0  ;;  %2197 = vmatmul.mubr.msk.bf16.vlgmr.msra.gmra.mxu1 %vm1025_vm2, %v1020_v11 }
 0x22a   : > { %v628_v18 = vpop.f32.mrf.mxu0  ;;  %v904_v19 = vpop.f32.mrf.mxu1  ;;  %2177 = vmatpush3.bf16.xpose.msra.mxu0 %v1030_v16  ;;  %2207 = vmatpush3.bf16.msra.mxu1 %v1321_v17 }
 0x22b   : > { %2188 = vmatprep.subr.bf16.mxu0 %v2434_v9  ;;  %2208 = vmatprep.mubr.msk.bf16.mxu1 %vm2435_vm1, %v2434_v9 }
 0x22c   : > { %v2119_v20 = vpop.f32.mrf.mxu0  ;;  %v2159_v21 = vpop.f32.mrf.mxu1  ;;  %2218 = vmatprep.subr.bf16.mxu1 %v2434_v9 }
 0x22e   : > { %v729_v22 = vpop.f32.mrf.mxu0  ;;  %v2716_v23 = vpop.f32.mrf.mxu1 }
 0x22f   : > { %v1023_v25 = vpack.c.bf16 %v729_v22, %v729_v22 }
 0x230   : > { %v2134_v26 = vpop.f32.mrf.mxu0  ;;  %v2174_v27 = vpop.f32.mrf.mxu1 }
 0x231   : > { %v1122_v28 = vsel %vm1025_vm2, %v1023_v25, 0  ;;  %2179 = vmatmul.mubr.msk.bf16.vlgmr.msra.gmra.mxu0 %vm1025_vm2, %v1017_v24 }
 0x232   : > { %v732_v29 = vpop.f32.mrf.mxu0  ;;  %v1008_v30 = vpop.f32.mrf.mxu1  ;;  %2189 = vmatpush3.bf16.xpose.msra.mxu0 %v1122_v28  ;;  %2190 = vmatprep.mubr.msk.bf16.mxu0 %vm2435_vm1, %v2434_v9 }
 0x233   : > { %2200 = vmatprep.subr.bf16.mxu0 %v2434_v9 }
 0x234   : > { %v2135_v31 = vpop.f32.mrf.mxu0  ;;  %v2175_v32 = vpop.f32.mrf.mxu1 }
 0x236   : > { %v849_v33 = vpop.f32.mrf.mxu0 }
 0x237   : > { %v1266_v35 = vpack.c.bf16 %v849_v33, %v849_v33 }
 0x238   : > { %v2150_v36 = vpop.f32.mrf.mxu0 }
 0x239   : > { %v1275_v37 = vsel %vm1273_vm3, %v1266_v35, 0  ;;  %2191 = vmatmul.mubr.msk.bf16.vlgmr.msra.gmra.mxu0 %vm1025_vm2, %v1019_v34 }
 0x23a   : > { %v852_v38 = vpop.f32.mrf.mxu0  ;;  %2201 = vmatpush3.bf16.msra.mxu0 %v1275_v37  ;;  %2202 = vmatprep.mubr.msk.bf16.mxu0 %vm2435_vm1, %v2434_v9 }
 0x23b   : > { %2212 = vmatprep.subr.bf16.mxu0 %v2434_v9 }
 0x23c   : > { %v2151_v39 = vpop.f32.mrf.mxu0 }
 0x23e   : > { %v2730_v40 = vpop.f32.mrf.mxu0 }
 0x240   : > { %v2166_v41 = vpop.f32.mrf.mxu0 }
 0x242   : > { %v956_v42 = vpop.f32.mrf.mxu0 }
 0x243   : > { %v1268_v42 = vpack.c.bf16 %v2730_v40, %v2730_v40 }
 0x244   : > { %v2167_v43 = vpop.f32.mrf.mxu0 }
 0x2e1   : > { %v1112_v44 = vpop.f32.mrf.mxu1 }
 0x2e2   : > { %v1211_v56 = vmul.f32 0.8408964, %v1112_v44 }
 0x2e3   : > { %v2186_v45 = vpop.f32.mrf.mxu1 }
 0x2e4   : > { %v1215_v2 = vadd.f32 %v1211_v56, %v1016_v60 }
 0x2e5   : > { %v1115_v46 = vpop.f32.mrf.mxu1 }
 0x2e6   : > { %v1221_v6 = vsel %vm1025_vm2, %v1215_v2, -inf  ;;  %v1269_v46 = vpack.c.bf16 %v2716_v23, %v2716_v23  ;;  %v1459_v23 = vld [vmem:[%s2909_s4] sm:$0xf] }
 0x2e7   : > { %v2187_v47 = vpop.f32.mrf.mxu1 }
 0x2e8   : > { %v1367_v47 = vsel %vm1273_vm3, %v1268_v42, 0  ;;  %v1413_v51 = vsel %vm1273_vm3, %v1269_v46, 0 }
 0x2e9   : > { %v1204_v49 = vpop.f32.mrf.mxu1 }
 0x2ea   : > { %v1213_v63 = vmul.f32 0.8408964, %v1204_v49 }
 0x2eb   : > { %v2198_v50 = vpop.f32.mrf.mxu1 }
 0x2ec   : > { %v1217_v7 = vadd.f32 %v1213_v63, %v1016_v60 }
 0x2ed   : > { %v1207_v53 = vpop.f32.mrf.mxu1 }
 0x2ee   : > { %v1227_v12 = vsel %vm1025_vm2, %v1217_v7, -inf }
 0x2ef   : > { %v2199_v54 = vpop.f32.mrf.mxu1 }
 0x2f1   : > { %v1066_v55 = vpop.f32.mrf.mxu0 }
 0x2f2   : > { %v1210_v57 = vmul.f32 0.8408964, %v1066_v55  ;;  %v1467_v55 = vsel %vm1273_vm3, %v1459_v23, 0 }
 0x2f3   : > { %v2180_v58 = vpop.f32.mrf.mxu0 }
 0x2f4   : > { %v1214_v61 = vadd.f32 %v1210_v57, %v1016_v60  ;;  %v1460_v57 = vld [vmem:[%s2909_s4 + $0x4] sm:$0xf] }
 0x2f5   : > { %v1069_v62 = vpop.f32.mrf.mxu0  ;;  %v1513_v58 = vsel %vm1273_vm3, %v1460_v57, 0  ;;  %v2347_v57 = vld [vmem:[%s2911_s6 + $0x20] sm:$0xff]  }
 0x2f6   : > { %v1218_v1 = vsel %vm1025_vm2, %v1214_v61, -inf  ;;  %v1559_v62 = vsel %vm1273_vm3, %v1461_v59, 0  ;;  %v2349_v59 = vld [vmem:[%s2911_s6 + $0x10] sm:$0xff]  }
 0x2f7   : > { %1219 = vmax.xlane.f32.xlu1 %v1218_v1  ;;  %v2181_v3 = vpop.f32.mrf.mxu0  ;;  %v1462_v1 = vld [vmem:[%s2909_s4 + $0xc] sm:$0xf] }
 0x2f9   : > { %v1158_v4 = vpop.f32.mrf.mxu0 }
 0x2fa   : > { %v1212_v5 = vmul.f32 0.8408964, %v1158_v4 }
 0x2fb   : > { %1222 = vmax.xlane.f32.xlu1 %v1221_v6  ;;  %v2192_v8 = vpop.f32.mrf.mxu0 }
 0x2fc   : > { %v1216_v10 = vadd.f32 %v1212_v5, %v1016_v60  ;;  %v1605_v5 = vsel %vm1273_vm3, %v1462_v1, 0  ;;  %v1989_v1 = vld [vmem:[%s2912_s7 + $0x2] ss:$0 sm:$0xff] }
 0x2fd   : > { %v1161_v11 = vpop.f32.mrf.mxu0 }
 0x2fe   : > { %v1224_v13 = vsel %vm1025_vm2, %v1216_v10, -inf }
 0x2ff   : > { %1228 = vmax.xlane.f32.xlu1 %v1227_v12  ;;  %1225 = vmax.xlane.f32.xlu0 %v1224_v13  ;;  %v2193_v14 = vpop.f32.mrf.mxu0 }
 0x380   : > { %v1220_v15 = vpop.xlane.xlu1 %1219 }
 0x381   : > { %v1230_v16 = vsub.f32 %v1214_v61, %v1220_v15 }
 0x383   : > { %v1234_v17 = vmul.f32 1.442695, %v1230_v16 }
 0x384   : > { %v1223_v18 = vpop.xlane.xlu1 %1222 }
 0x385   : > { %2354 = vpow2.f32 %v1234_v17  ;;  %v1231_v19 = vsub.f32 %v1215_v2, %v1223_v18 }
 0x387   : > { %v1236_v20 = vmul.f32 1.442695, %v1231_v19 }
 0x388   : > { %v1229_v21 = vpop.xlane.xlu1 %1228  ;;  %v1226_v22 = vpop.xlane.xlu0 %1225 }
 0x389   : > { %2356 = vpow2.f32 %v1236_v20  ;;  %v1233_v24 = vsub.f32 %v1217_v7, %v1229_v21  ;;  %v1232_v25 = vsub.f32 %v1216_v10, %v1226_v22 }
 0x38b   : > { %v1240_v26 = vmul.f32 1.442695, %v1233_v24  ;;  %v1238_v27 = vmul.f32 1.442695, %v1232_v25 }
 0x38d   : > { %2358 = vpow2.f32 %v1240_v26 }
 0x38e   : > { %2360 = vpow2.f32 %v1238_v27 }
 0x392   : > { %v2355_v28 = vpop.eup %2354 }
 0x393   : > { %v1242_v29 = vsel %vm1025_vm2, %v2355_v28, 0.0 }
 0x394   : > { %1243 = vadd.xlane.f32.xlu0 %v1242_v29 }
 0x396   : > { %v2357_v30 = vpop.eup %2356 }
 0x397   : > { %v1245_v31 = vsel %vm1025_vm2, %v2357_v30, 0.0 }
 0x398   : > { %1246 = vadd.xlane.f32.xlu1 %v1245_v31 }
 0x39a   : > { %v2359_v32 = vpop.eup %2358 }
 0x39b   : > { %v2361_v33 = vpop.eup %2360  ;;  %v1251_v34 = vsel %vm1025_vm2, %v2359_v32, 0.0 }
 0x39c   : > { %1252 = vadd.xlane.f32.xlu1 %v1251_v34  ;;  %v1248_v35 = vsel %vm1025_vm2, %v2361_v33, 0.0 }
 0x39d   : > { %1249 = vadd.xlane.f32.xlu0 %v1248_v35 }
 0x41d   : > { %v1244_v36 = vpop.xlane.xlu0 %1243 }
 0x41e   : > { %2362 = vrcp.f32 %v1244_v36 }
 0x421   : > { %v1247_v37 = vpop.xlane.xlu1 %1246 }
 0x422   : > { %2364 = vrcp.f32 %v1247_v37 }
 0x425   : > { %v1253_v38 = vpop.xlane.xlu1 %1252 }
 0x426   : > { %2366 = vrcp.f32 %v1253_v38  ;;  %v1250_v39 = vpop.xlane.xlu0 %1249 }
 0x427   : > { %2368 = vrcp.f32 %v1250_v39  ;;  %v1988_v39 = vld [vmem:[%s2912_s7 + $0x4] ss:$0 sm:$0xff] }
 0x42b   : > { %v2363_v41 = vpop.eup %2362 }
 0x42c   : > { %v1258_v43 = vmul.f32 %v2363_v41, %v2355_v28 }
 0x42e   : > { %v1262_v44 = vpack.c.bf16 %v1258_v43, %v1258_v43 }
 0x42f   : > { %v2365_v45 = vpop.eup %2364 }
 0x430   : > { %2203 = vmatmul.mubr.msk.bf16.vlgmr.msra.gmra.mxu0 %vm1025_vm2, %v1262_v44  ;;  %v1259_v48 = vmul.f32 %v2365_v45, %v2357_v30 }
 0x431   : > { %2213 = vmatpush3.bf16.msra.mxu0 %v1367_v47  ;;  %2214 = vmatprep.mubr.msk.bf16.mxu0 %vm2435_vm1, %v2434_v9 }
 0x432   : > { %v1263_v49 = vpack.c.bf16 %v1259_v48, %v1259_v48  ;;  %2224 = vmatprep.subr.bf16.mxu0 %v2434_v9 }
 0x433   : > { %v2367_v50 = vpop.eup %2366 }
 0x434   : > { %v2369_v40 = vpop.eup %2368  ;;  %2209 = vmatmul.mubr.msk.bf16.vlgmr.msra.gmra.mxu1 %vm1025_vm2, %v1263_v49  ;;  %v1261_v53 = vmul.f32 %v2367_v50, %v2359_v32 }
 0x435   : > { %2219 = vmatpush3.bf16.msra.mxu1 %v1413_v51  ;;  %v1260_v52 = vmul.f32 %v2369_v40, %v2361_v33  ;;  %2220 = vmatprep.mubr.msk.bf16.mxu1 %vm2435_vm1, %v2434_v9 }
 0x436   : > { %2230 = vmatprep.subr.bf16.mxu1 %v2434_v9  ;;  %v1265_v56 = vpack.c.bf16 %v1261_v53, %v1261_v53  ;;  %v2342_v53 = vld [vmem:[%s2910_s5 + $0x8] sm:$0xff]  }
 0x437   : > { %v1264_v54 = vpack.c.bf16 %v1260_v52, %v1260_v52 }
 0x439   : > { %2215 = vmatmul.mubr.msk.bf16.vlgmr.msra.gmra.mxu0 %vm1025_vm2, %v1264_v54  ;;  %v2344_v54 = vld [vmem:[%s2911_s6 + $0x38] sm:$0xff]  }
 0x43a   : > { %2225 = vmatpush3.bf16.msra.mxu0 %v1467_v55  ;;  %2226 = vmatprep.mubr.msk.bf16.mxu0 %vm2435_vm1, %v2434_v9  ;;  %v2345_v55 = vld [vmem:[%s2911_s6 + $0x30] sm:$0xff]  }
 0x43b   : > { %2236 = vmatprep.subr.bf16.mxu0 %v2434_v9 }
 0x43c   : > { %2221 = vmatmul.mubr.msk.bf16.vlgmr.msra.gmra.mxu1 %vm1025_vm2, %v1265_v56  ;;  %v2346_v56 = vld [vmem:[%s2911_s6 + $0x28] sm:$0xff]  }
 0x43d   : > { %2232 = vmatprep.mubr.msk.bf16.mxu1 %vm2435_vm1, %v2434_v9  ;;  %2231 = vmatpush3.bf16.msra.mxu1 %v1513_v58  ;;  %v2348_v58 = vld [vmem:[%s2911_s6 + $0x18] sm:$0xff]  }
 0x43e   : > { %2242 = vmatprep.subr.bf16.mxu1 %v2434_v9 }
 0x4f0   : > { %v1311_v60 = vpop.f32.mrf.mxu0 }
 0x4f1   : > { %v1455_v61 = vpack.c.bf16 %v1311_v60, %v1311_v60 }
 0x4f2   : > { %v2204_v63 = vpop.f32.mrf.mxu0 }
 0x4f3   : > { %2227 = vmatmul.mubr.msk.bf16.vlgmr.msra.gmra.mxu0 %vm1025_vm2, %v1455_v61 }
 0x4f4   : > { %v1314_v2 = vpop.f32.mrf.mxu0  ;;  %v1357_v3 = vpop.f32.mrf.mxu1  ;;  %2237 = vmatpush3.bf16.msra.mxu0 %v1559_v62  ;;  %2238 = vmatprep.mubr.msk.bf16.mxu0 %vm2435_vm1, %v2434_v9 }
 0x4f5   : > { %v1456_v4 = vpack.c.bf16 %v1357_v3, %v1357_v3  ;;  %2248 = vmatprep.subr.bf16.mxu0 %v2434_v9  ;;  %v1990_v3 = vld [vmem:[%s2912_s7 + $0x3] ss:$0 sm:$0xff] }
 0x4f6   : > { %v2205_v6 = vpop.f32.mrf.mxu0  ;;  %v2210_v7 = vpop.f32.mrf.mxu1 }
 0x4f7   : > { %2233 = vmatmul.mubr.msk.bf16.vlgmr.msra.gmra.mxu1 %vm1025_vm2, %v1456_v4  ;;  %v2350_v7 = vld [vmem:[%s2911_s6 + $0x8] sm:$0xff]  }
 0x4f8   : > { %v1360_v8 = vpop.f32.mrf.mxu1  ;;  %2243 = vmatpush3.bf16.msra.mxu1 %v1605_v5  ;;  %2244 = vmatprep.mubr.msk.bf16.mxu1 %vm2435_vm1, %v2434_v9 }
 0x4f9   : > { %v1403_v10 = vpop.f32.mrf.mxu0  ;;  %2256 = vmatprep.subr.bf16.mxu1 %v2434_v9  ;;  %v2351_v8 = vld [vmem:[%s2911_s6] sm:$0xff]  }
 0x4fa   : > { %v1457_v11 = vpack.c.bf16 %v1403_v10, %v1403_v10  ;;  %v2211_v12 = vpop.f32.mrf.mxu1  ;;  %v1991_v10 = vld [vmem:[%s2912_s7 + $0x6] ss:$0 sm:$0xff] }
 0x4fb   : > { %v2216_v13 = vpop.f32.mrf.mxu0 }
 0x4fc   : > { %2239 = vmatmul.mubr.msk.bf16.vlgmr.msra.gmra.mxu0 %vm1025_vm2, %v1457_v11  ;;  %v1449_v14 = vpop.f32.mrf.mxu1 }
 0x4fd   : > { %v1406_v15 = vpop.f32.mrf.mxu0  ;;  %v1458_v16 = vpack.c.bf16 %v1449_v14, %v1449_v14  ;;  %2252 = vmatprep.mubr.msk.bf16.mxu0 %vm2435_vm1, %v2434_v9  ;;  %2249 = vmatpush3.bf16.msra.mxu0 %v2342_v53 }
 0x4fe   : > { %v2222_v17 = vpop.f32.mrf.mxu1  ;;  %2250 = vmatprep.subr.bf16.mxu0 %v2434_v9 }
 0x4ff   : > { %v2217_v18 = vpop.f32.mrf.mxu0  ;;  %2245 = vmatmul.mubr.msk.bf16.vlgmr.msra.gmra.mxu1 %vm1025_vm2, %v1458_v16 }
 0x500   : > { %v1452_v19 = vpop.f32.mrf.mxu1  ;;  %2272 = vmatprep.mubr.msk.bf16.mxu1 %vm2435_vm1, %v2434_v9  ;;  %2257 = vmatpush3.bf16.msra.mxu1 %v2344_v54 }
 0x501   : > { %2258 = vmatprep.subr.bf16.mxu1 %v2434_v9 }
 0x502   : > { %v2223_v20 = vpop.f32.mrf.mxu1 }
 0x504   : > { %2259 = vmatpush3.bf16.msra.mxu1 %v2345_v55 }
 0x505   : > { %2260 = vmatprep.subr.bf16.mxu1 %v2434_v9 }
 0x508   : > { %2261 = vmatpush3.bf16.msra.mxu1 %v2346_v56 }
 0x509   : > { %2262 = vmatprep.subr.bf16.mxu1 %v2434_v9 }
 0x50c   : > { %2263 = vmatpush3.bf16.msra.mxu1 %v2347_v57 }
 0x50d   : > { %2264 = vmatprep.subr.bf16.mxu1 %v2434_v9 }
 0x510   : > { %2265 = vmatpush3.bf16.msra.mxu1 %v2348_v58 }
 0x511   : > { %2266 = vmatprep.subr.bf16.mxu1 %v2434_v9 }
 0x514   : > { %2267 = vmatpush3.bf16.msra.mxu1 %v2349_v59 }
 0x515   : > { %2268 = vmatprep.subr.bf16.mxu1 %v2434_v9 }
 0x518   : > { %2269 = vmatpush3.bf16.msra.mxu1 %v2350_v7 }
 0x519   : > { %2270 = vmatprep.subr.bf16.mxu1 %v2434_v9  ;;  %v1995_v9 = vld [vmem:[%s2912_s7 + $0x5] ss:$0 sm:$0xff] }
 0x51c   : > { %2271 = vmatpush3.bf16.msra.mxu1 %v2351_v8 }
 0x5b3   : > { %v1503_v21 = vpop.f32.mrf.mxu0 }
 0x5b4   : > { %v1647_v30 = vsel %vm310_vm0, %v1503_v21, 0.0 }
 0x5b5   : > { %v2228_v22 = vpop.f32.mrf.mxu0 }
 0x5b7   : > { %v1506_v24 = vpop.f32.mrf.mxu0  ;;  %v1549_v25 = vpop.f32.mrf.mxu1 }
 0x5b8   : > { %v1648_v28 = vsel %vm310_vm0, %v1549_v25, 0.0 }
 0x5b9   : > { %v2229_v26 = vpop.f32.mrf.mxu0  ;;  %v2234_v27 = vpop.f32.mrf.mxu1  ;;  %v1649_v32 = vadd.f32 %v1648_v28, %v1647_v30 }
 0x5bb   : > { %v1552_v29 = vpop.f32.mrf.mxu1 }
 0x5bc   : > { %v1595_v31 = vpop.f32.mrf.mxu0 }
 0x5bd   : > { %v1650_v33 = vsel %vm310_vm0, %v1595_v31, 0.0  ;;  %v2235_v34 = vpop.f32.mrf.mxu1 }
 0x5be   : > { %v2240_v35 = vpop.f32.mrf.mxu0  ;;  %v1651_v36 = vadd.f32 %v1650_v33, %v1649_v32 }
 0x5bf   : > { %v1641_v37 = vpop.f32.mrf.mxu1 }
 0x5c0   : > { %v1598_v38 = vpop.f32.mrf.mxu0  ;;  %v1652_v41 = vsel %vm310_vm0, %v1641_v37, 0.0 }
 0x5c1   : > { %v1653_v42 = vadd.f32 %v1652_v41, %v1651_v36  ;;  %v2246_v43 = vpop.f32.mrf.mxu1 }
 0x5c2   : > { %v2241_v44 = vpop.f32.mrf.mxu0 }
 0x5c3   : > { %v1658_v45 = vadd.f32 %v1988_v39, %v1653_v42  ;;  %v1644_v46 = vpop.f32.mrf.mxu1 }
 0x5c5   : > { %v2247_v47 = vpop.f32.mrf.mxu1  ;;  %v2800_v48 = vadd.f32 %v1658_v45, %v2536_v0  ;;  %v2343_v0 = vld [vmem:[%s2910_s5] sm:$0xff]  }
 0x5c6   : > { %2251 = vmatpush3.bf16.msra.mxu0 %v2343_v0 }
 0x5c7   : > { %v1660_v49 = vsel %vm310_vm0, %v2800_v48, 0.0 }
 0x5c8   : > { %1661 = vadd.xlane.f32.xlu0 %v1660_v49 }
 0x651   : > { %v1662_v50 = vpop.xlane.xlu0 %1661 }
 0x652   : > { %v1663_v40 = vmul.f32 0.03125, %v1662_v50 }
 0x654   : > { %v1664_v51 = vsub.f32 %v2800_v48, %v1663_v40 }
 0x656   : > { %v1665_v23 = vmul.f32 %v1664_v51, %v1664_v51 }
 0x658   : > { %v1666_v52 = vsel %vm310_vm0, %v1665_v23, 0.0 }
 0x659   : > { %1667 = vadd.xlane.f32.xlu1 %v1666_v52 }
 0x6e2   : > { %v1668_v60 = vpop.xlane.xlu1 %1667 }
 0x6e3   : > { %v1669_v61 = vmul.f32 0.03125, %v1668_v60 }
 0x6e5   : > { %v1670_v62 = vadd.f32 1e-05, %v1669_v61 }
 0x6e7   : > { %2370 = vrsqrt.f32 %v1670_v62 }
 0x6f4   : > { %v2371_v63 = vpop.eup %2370 }
 0x6f5   : > { %v1672_v2 = vmul.f32 %v2371_v63, %v1664_v51 }
 0x6f7   : > { %v1677_v4 = vmul.f32 %v1989_v1, %v1672_v2 }
 0x6f9   : > { %v1682_v5 = vadd.f32 %v1990_v3, %v1677_v4 }
 0x6fb   : > { %v1683_v6 = vpack.c.bf16 %v1682_v5, %v1682_v5 }
 0x6fd   : > { %2253 = vmatmul.mubr.msk.bf16.vlgmr.msra.gmra.mxu0 %vm310_vm0, %v1683_v6 }
 0x7bd   : > { %v1741_v11 = vpop.f32.mrf.mxu0 }
 0x7be   : > { %v1742_v12 = vadd.f32 %v1991_v10, %v1741_v11 }
 0x7bf   : > { %v2254_v13 = vpop.f32.mrf.mxu0 }
 0x7c0   : > { %v1747_v14 = vmax.f32 %v1742_v12, 0.0 }
 0x7c1   : > { %v1744_v15 = vpop.f32.mrf.mxu0 }
 0x7c2   : > { %v1748_v16 = vpack.c.bf16 %v1747_v14, %v1747_v14 }
 0x7c3   : > { %v2255_v17 = vpop.f32.mrf.mxu0 }
 0x7c4   : > { %2273 = vmatmul.mubr.bf16.vlgmr.msra.gmra.mxu1 %v1748_v16 }
 0x884   : > { %v1851_v18 = vpop.f32.mrf.mxu1 }
 0x885   : > { %v1852_v19 = vadd.f32 %v1995_v9, %v1851_v18 }
 0x886   : > { %v2274_v20 = vpop.f32.mrf.mxu1 }
 0x887   : > { %v1857_v21 = vadd.f32 %v1852_v19, %v2800_v48 }
 0x888   : > { %v1854_v22 = vpop.f32.mrf.mxu1 }
 0x889   : > { %1858 = vst.msk [vmem:[%s296_s24] sm:$0xff] %vm310_vm0, %v1857_v21 }
 0x88a   : > { %v2275_v24 = vpop.f32.mrf.mxu1 }
 0x88b   : > { %2385 = shalt.err (!%p2382_p3)
}
 0x88c   : > { %s2386_s21 = scalar_lea.hbm %s2863_s12, 128  ;;  %s2390_s23 = scalar_lea.hbm %s2913_s8, 256 }
 0x88d   : > { %p2387_p4 = scmp.ne.s32.totalorder %s2863_s12, %s2386_s21  ;;  %p2391_p9 = scmp.lt.s32.totalorder %s2863_s12, %s2913_s8 }
 0x88e   : > { %p2392_p10 = scmp.lt.s32.totalorder %s2390_s23, %s2386_s21 }
 0x88f   : > { %p2388_p7 = pnand %p2387_p4, %p2521_p5 }
 0x890   : > { %p2393_p11 = por %p2392_p10, %p2391_p9 }
 0x891   : > { %p2389_p8 = pneg %p2388_p7 }
 0x893   : > { %p2394_p12 = pnand %p2393_p11, %p2389_p8 }
 0x895   : > { %2397 = shalt.err (!%p2394_p12)
}
 0x896   : > { %2276 = dma.vmem_to_hbm [thread:$0]  (%p2521_p5), %s2865_s25, 128, %s2863_s12, %s1860_s9  }
 0x897 PF: > { %p2282_p13 = scmp.ge.s32.totalorder %s2432_s30, 2  ;;  %s1885_s10 = sand.u32 1, %s2420_s27  }
 0x898   : > { %s1886_s13 = scalar_lea.sflag [#allocation3], %s1885_s10 }
 0x899   : > { %p2279_p0 = pnand %p2282_p13, %p2525_p6 }
 0x89b   : > { %p2280_p1 = pneg %p2279_p0 }
 0x89d   : > { %2415 = dma.done.wait (%p2280_p1), %s1886_s13, 128  }
 0x89e   : > { %2417 = vsyncadd (%p2280_p1), %s1886_s13, 4294967168  ;;  %p18_p2 = scmp.ge.s32.totalorder %s2508_s11, 4   ;;  %s2916_s27 = smov %s2424_s28 }
 0x89f   : > { %s2917_s28 = smov %s2428_s29  ;;  %s2918_s29 = smov %s2519_s14 }
 0x8a0   : > { %s2919_s30 = smov %s2508_s11  ;;  %20 = sbr.rel (!%p18_p2) target bundleno = 3 (0x3), region = 87 }
 0x8a5   :  { %1891 = vsyncpa [#allocation3], 1 }
 0x8a6   :  { %1893 = vsyncpa [#allocation3 + $0x1], 1 }

</bundles_post_ra>
